<compile_context>
chip_gen: v7x
topology: tpu7x:2x2x1
jax: 0.10.0
libtpu: 0.0.40
codegen_flags: <defaults>
</compile_context>

<pallas_src>
import functools

import jax
import jax.numpy as jnp
from jax.experimental import pallas as pl
from jax.experimental.pallas import tpu as pltpu

EPS = 1e-5
_MAX_TILE_ROWS = 2048


# ----------------------------------------------------------------------------
# VMEM budget (generation aware)
# ----------------------------------------------------------------------------
@functools.lru_cache(maxsize=None)
def _vmem_budget_bytes():
    try:
        cap = int(pltpu.get_tpu_info().vmem_capacity_bytes)
    except Exception:
        return 32 * 1024 * 1024                      # safe everywhere
    if cap >= 100 * 1024 * 1024:                     # v5e / v6e: 128 MiB physical
        return 64 * 1024 * 1024
    # v7x: 64 MiB physical per TensorCore -> keep scoped budget well below it.
    return max(16 * 1024 * 1024, min(40 * 1024 * 1024, int(cap * 0.62)))


# ----------------------------------------------------------------------------
# Kernel helpers
# ----------------------------------------------------------------------------
def _fold_packed_lanes(v, feat, lane_w):
    """Sum lanes holding the same feature (lane l <-> feature l % feat) and
    broadcast the result back to every lane.  log2(lane_w/feat) XLU rolls.
    No-op when feat == lane_w (unpacked layout)."""
    shift = lane_w // 2
    while shift >= feat:
        v = v + pltpu.roll(v, shift=shift, axis=1)
        shift //= 2
    return v


# ----------------------------------------------------------------------------
# Kernels
# ----------------------------------------------------------------------------
def _fused_bn_kernel(x_ref, gamma_ref, beta_ref, o_ref, *, inv_n, feat, lane_w):
    """Single-pass BatchNorm for slabs that fit in VMEM (one HBM read).
    Uses the (x - mean)^2 variance formulation (no cancellation issues)."""
    x = x_ref[...].astype(jnp.float32)
    mean = _fold_packed_lanes(jnp.sum(x, axis=0, keepdims=True), feat, lane_w) * inv_n
    c = x - mean
    var = _fold_packed_lanes(jnp.sum(c * c, axis=0, keepdims=True), feat, lane_w) * inv_n
    scale = gamma_ref[...] * jax.lax.rsqrt(var + EPS)
    o_ref[...] = (c * scale + beta_ref[...]).astype(o_ref.dtype)


def _stats_kernel(x_ref, gamma_ref, beta_ref, scale_ref, shift_ref,
                  sum_sc, sumsq_sc, *, rows, tile_rows, inv_n, feat, lane_w):
    """Streaming pass 1: accumulate per-lane sum / sum-of-squares over row
    tiles; at the last grid step fold packed lanes and emit the per-feature
    scale/shift directly (no host-side epilogue between the two passes)."""
    i = pl.program_id(0)

    @pl.when(i == 0)
    def _init():
        sum_sc[...] = jnp.zeros_like(sum_sc)
        sumsq_sc[...] = jnp.zeros_like(sumsq_sc)

    x = x_ref[...].astype(jnp.float32)
    if rows % tile_rows != 0:
        # Mask the ragged tail of the last (partial) row block.
        rid = jax.lax.broadcasted_iota(jnp.int32, x.shape, 0) + i * tile_rows
        x = jnp.where(rid < rows, x, 0.0)
    sum_sc[...] += jnp.sum(x, axis=0, keepdims=True)
    sumsq_sc[...] += jnp.sum(x * x, axis=0, keepdims=True)

    @pl.when(i == pl.num_programs(0) - 1)
    def _finalize():
        s = _fold_packed_lanes(sum_sc[...], feat, lane_w)
        q = _fold_packed_lanes(sumsq_sc[...], feat, lane_w)
        mean = s * inv_n
        # TODO(synk): E[x^2] - mean^2 can lose precision for strongly
        # off-center data; a shifted sum-of-squares would be more robust.
        var = jnp.maximum(q * inv_n - mean * mean, 0.0)
        scale = gamma_ref[...] * jax.lax.rsqrt(var + EPS)
        scale_ref[...] = scale
        shift_ref[...] = beta_ref[...] - mean * scale


def _apply_kernel(x_ref, scale_ref, shift_ref, o_ref):
    """Streaming pass 2: pure FMA  y = x * scale + shift."""
    o_ref[...] = (x_ref[...].astype(jnp.float32) * scale_ref[...]
                  + shift_ref[...]).astype(o_ref.dtype)


# ----------------------------------------------------------------------------
# Wrappers
# ----------------------------------------------------------------------------
def _pick_tile_rows(lane_w, tile_bytes, rows):
    """Largest row tile (multiple of 8, capped at _MAX_TILE_ROWS) in budget."""
    t = (tile_bytes // (lane_w * 4)) // 8 * 8
    t = max(8, min(_MAX_TILE_ROWS, t))
    if rows >= 8:
        t = min(t, (rows // 8) * 8)
    return int(t)


def batch_norm_1d_pallas(x2d, gamma, beta):
    """BatchNorm1d (training-mode forward) over an (N, D) array, affine=True."""
    n, d = x2d.shape
    budget = _vmem_budget_bytes()
    fused_bytes = budget // 8
    tile_bytes = budget // 8

    # Lane packing: fold narrow-D slabs into a 128-lane-dense layout so every
    # DMA / store uses full vector registers (lane l holds feature l % d).
    reps = 1
    xw = x2d
    if d < 128 and 128 % d == 0 and (n * d) % 128 == 0:
        reps = 128 // d
        xw = x2d.reshape((n * d) // 128, 128)
    rows, lane_w = xw.shape

    gamma_f = gamma.astype(jnp.float32)
    beta_f = beta.astype(jnp.float32)
    if reps > 1:
        gamma_f = jnp.tile(gamma_f, reps)
        beta_f = jnp.tile(beta_f, reps)
    gamma_p = gamma_f.reshape(1, lane_w)
    beta_p = beta_f.reshape(1, lane_w)

    slab_bytes = rows * lane_w * 4
    inv_n = 1.0 / n          # true element count per feature (pre-packing)

    # --- Fused single-pass path ----------------------------------------------
    if slab_bytes <= fused_bytes:
        out = pl.pallas_call(
            functools.partial(_fused_bn_kernel, inv_n=inv_n, feat=d, lane_w=lane_w),
            out_shape=jax.ShapeDtypeStruct((rows, lane_w), x2d.dtype),
            grid_spec=pltpu.PrefetchScalarGridSpec(
                num_scalar_prefetch=0,
                grid=(1,),
                in_specs=[
                    pl.BlockSpec((rows, lane_w), lambda i: (0, 0)),
                    pl.BlockSpec((1, lane_w), lambda i: (0, 0)),
                    pl.BlockSpec((1, lane_w), lambda i: (0, 0)),
                ],
                out_specs=pl.BlockSpec((rows, lane_w), lambda i: (0, 0)),
            ),
            compiler_params=pltpu.CompilerParams(
                dimension_semantics=("arbitrary",),
                vmem_limit_bytes=budget),
        )(xw, gamma_p, beta_p)
    else:
        # --- Two-pass streaming path -----------------------------------------
        tile_n = _pick_tile_rows(lane_w, tile_bytes, rows)
        n_blocks = pl.cdiv(rows, tile_n)

        scale, shift = pl.pallas_call(
            functools.partial(_stats_kernel, rows=rows, tile_rows=tile_n,
                              inv_n=inv_n, feat=d, lane_w=lane_w),
            out_shape=(jax.ShapeDtypeStruct((1, lane_w), jnp.float32),
                       jax.ShapeDtypeStruct((1, lane_w), jnp.float32)),
            grid_spec=pltpu.PrefetchScalarGridSpec(
                num_scalar_prefetch=0,
                grid=(n_blocks,),
                in_specs=[
                    pl.BlockSpec((tile_n, lane_w), lambda i: (i, 0)),
                    pl.BlockSpec((1, lane_w), lambda i: (0, 0)),
                    pl.BlockSpec((1, lane_w), lambda i: (0, 0)),
                ],
                out_specs=(
                    pl.BlockSpec((1, lane_w), lambda i: (0, 0)),
                    pl.BlockSpec((1, lane_w), lambda i: (0, 0)),
                ),
                scratch_shapes=[pltpu.VMEM((1, lane_w), jnp.float32),
                                pltpu.VMEM((1, lane_w), jnp.float32)],
            ),
            compiler_params=pltpu.CompilerParams(
                dimension_semantics=("arbitrary",),
                vmem_limit_bytes=budget),
        )(xw, gamma_p, beta_p)

        out = pl.pallas_call(
            _apply_kernel,
            out_shape=jax.ShapeDtypeStruct((rows, lane_w), x2d.dtype),
            grid_spec=pltpu.PrefetchScalarGridSpec(
                num_scalar_prefetch=0,
                grid=(n_blocks,),
                in_specs=[
                    pl.BlockSpec((tile_n, lane_w), lambda i: (i, 0)),
                    pl.BlockSpec((1, lane_w), lambda i: (0, 0)),
                    pl.BlockSpec((1, lane_w), lambda i: (0, 0)),
                ],
                out_specs=pl.BlockSpec((tile_n, lane_w), lambda i: (i, 0)),
            ),
            compiler_params=pltpu.CompilerParams(
                dimension_semantics=("parallel",),
                vmem_limit_bytes=budget),
        )(xw, scale, shift)

    if reps > 1:
        out = out.reshape(n, d)
    return out


def normalization_forward(x, gamma, beta):
    """Equivalent of Normalization(embed_dim, 'batch').forward(x) in train mode."""
    b, s, d = x.shape
    y2d = batch_norm_1d_pallas(x.reshape(b * s, d), gamma, beta)
    return y2d.reshape(b, s, d)

# TODO(synk): the 'instance' (nn.InstanceNorm1d) branch and BatchNorm's
# running-mean/var buffer updates (training-time side effects, not part of the
# returned value) are not modeled.


if __name__ == "__main__":
    def _ref(x, gamma, beta):
        d = x.shape[-1]
        x2d = x.reshape(-1, d).astype(jnp.float32)
        mean = jnp.mean(x2d, axis=0, keepdims=True)
        var = jnp.mean((x2d - mean) ** 2, axis=0, keepdims=True)
        y = (x2d - mean) / jnp.sqrt(var + EPS) * gamma + beta
        return y.reshape(x.shape)

    key = jax.random.PRNGKey(0)
    fwd = jax.jit(normalization_forward)

    # Primary module-sized case (batch=2, seq=8, embed_dim=32) hits the fused
    # lane-packed path; the others exercise the unpacked fused path and the
    # two-pass streaming path (packed + unpacked) with ragged row tiles.
    cases = [(2, 8, 32), (3, 700, 256), (4, 9000, 64), (2, 5000, 384)]
    for (B, S, D) in cases:
        key, kx, kg, kb = jax.random.split(key, 4)
        x = jax.random.normal(kx, (B, S, D), dtype=jnp.float32)
        stdv = 1.0 / (D ** 0.5)   # matches init_parameters() uniform(-stdv, stdv)
        gamma = jax.random.uniform(kg, (D,), minval=-stdv, maxval=stdv,
                                   dtype=jnp.float32)
        beta = jax.random.uniform(kb, (D,), minval=-stdv, maxval=stdv,
                                  dtype=jnp.float32)
        y = jax.block_until_ready(fwd(x, gamma, beta))
        y_ref = _ref(x, gamma, beta)
        assert jnp.allclose(y, y_ref, atol=1e-4, rtol=1e-4), f"mismatch at {(B, S, D)}"

    print("KERNEL_OK")
</pallas_src>

<mosaic_0001>
module attributes {stable_mosaic.version = 11 : i64} {
  func.func @_fused_bn_kernel(%arg0: i32, %arg1: memref<4x128xf32, #tpu.memory_space<vmem>>, %arg2: memref<1x128xf32, #tpu.memory_space<vmem>>, %arg3: memref<1x128xf32, #tpu.memory_space<vmem>>, %arg4: memref<4x128xf32, #tpu.memory_space<vmem>>) attributes {dimension_semantics = [#tpu.dimension_semantics<arbitrary>], iteration_bounds = array<i64: 1>, scalar_prefetch = 0 : i64, scratch_operands = 0 : i64, tpu.core_type = #tpu.core_type<tc>, window_params = [{pipeline_mode = #tpu.pipeline_mode<synchronous>, transform_indices = @transform_0, window_bounds = array<i64: 4, 128>}, {pipeline_mode = #tpu.pipeline_mode<synchronous>, transform_indices = @transform_1, window_bounds = array<i64: 1, 128>}, {pipeline_mode = #tpu.pipeline_mode<synchronous>, transform_indices = @transform_2, window_bounds = array<i64: 1, 128>}, {pipeline_mode = #tpu.pipeline_mode<synchronous>, transform_indices = @transform_3, window_bounds = array<i64: 4, 128>}]} {
    %c0 = arith.constant 0 : index
    %c0_0 = arith.constant 0 : index
    %0 = vector.load %arg1[%c0, %c0_0] : memref<4x128xf32, #tpu.memory_space<vmem>>, vector<4x128xf32>
    %cst = arith.constant dense<0.000000e+00> : vector<128xf32>
    %1 = vector.multi_reduction <add>, %0, %cst [0] : vector<4x128xf32> to vector<128xf32>
    %2 = vector.shape_cast %1 : vector<128xf32> to vector<1x128xf32>
    %c64_i32 = arith.constant 64 : i32
    %3 = tpu.dynamic_rotate %2 by %c64_i32 dim 1 : vector<1x128xf32>, i32 -> vector<1x128xf32>
    %4 = arith.addf %2, %3 : vector<1x128xf32>
    %c32_i32 = arith.constant 32 : i32
    %5 = tpu.dynamic_rotate %4 by %c32_i32 dim 1 : vector<1x128xf32>, i32 -> vector<1x128xf32>
    %6 = arith.addf %4, %5 : vector<1x128xf32>
    %cst_1 = arith.constant 6.250000e-02 : f32
    %7 = vector.broadcast %cst_1 : f32 to vector<1x128xf32>
    %8 = arith.mulf %6, %7 : vector<1x128xf32>
    %9 = vector.broadcast %8 : vector<1x128xf32> to vector<4x128xf32>
    %10 = arith.subf %0, %9 : vector<4x128xf32>
    %11 = arith.mulf %10, %10 : vector<4x128xf32>
    %cst_2 = arith.constant dense<0.000000e+00> : vector<128xf32>
    %12 = vector.multi_reduction <add>, %11, %cst_2 [0] : vector<4x128xf32> to vector<128xf32>
    %13 = vector.shape_cast %12 : vector<128xf32> to vector<1x128xf32>
    %c64_i32_3 = arith.constant 64 : i32
    %14 = tpu.dynamic_rotate %13 by %c64_i32_3 dim 1 : vector<1x128xf32>, i32 -> vector<1x128xf32>
    %15 = arith.addf %13, %14 : vector<1x128xf32>
    %c32_i32_4 = arith.constant 32 : i32
    %16 = tpu.dynamic_rotate %15 by %c32_i32_4 dim 1 : vector<1x128xf32>, i32 -> vector<1x128xf32>
    %17 = arith.addf %15, %16 : vector<1x128xf32>
    %cst_5 = arith.constant 6.250000e-02 : f32
    %18 = vector.broadcast %cst_5 : f32 to vector<1x128xf32>
    %19 = arith.mulf %17, %18 : vector<1x128xf32>
    %c0_6 = arith.constant 0 : index
    %c0_7 = arith.constant 0 : index
    %20 = vector.load %arg2[%c0_6, %c0_7] : memref<1x128xf32, #tpu.memory_space<vmem>>, vector<1x128xf32>
    %cst_8 = arith.constant 9.99999974E-6 : f32
    %21 = vector.broadcast %cst_8 : f32 to vector<1x128xf32>
    %22 = arith.addf %19, %21 : vector<1x128xf32>
    %23 = math.rsqrt %22 : vector<1x128xf32>
    %24 = arith.mulf %20, %23 : vector<1x128xf32>
    %25 = vector.broadcast %24 : vector<1x128xf32> to vector<4x128xf32>
    %26 = arith.mulf %10, %25 : vector<4x128xf32>
    %c0_9 = arith.constant 0 : index
    %c0_10 = arith.constant 0 : index
    %27 = vector.load %arg3[%c0_9, %c0_10] : memref<1x128xf32, #tpu.memory_space<vmem>>, vector<1x128xf32>
    %28 = vector.broadcast %27 : vector<1x128xf32> to vector<4x128xf32>
    %29 = arith.addf %26, %28 : vector<4x128xf32>
    %c0_11 = arith.constant 0 : index
    %c0_12 = arith.constant 0 : index
    %30 = vector.load %arg4[%c0_11, %c0_12] : memref<4x128xf32, #tpu.memory_space<vmem>>, vector<4x128xf32>
    tpu.vector_store %arg4[%c0_11, %c0_12], %29 {strides = array<i32>} : memref<4x128xf32, #tpu.memory_space<vmem>>, vector<4x128xf32>,
    return
  }
  func.func @transform_0(%arg0: i32) -> (i32, i32) {
    %c0_i32 = arith.constant 0 : i32
    %c0_i32_0 = arith.constant 0 : i32
    %c0_i32_1 = arith.constant 0 : i32
    return %c0_i32, %c0_i32_0 : i32, i32
  }
  func.func @transform_1(%arg0: i32) -> (i32, i32) {
    %c0_i32 = arith.constant 0 : i32
    %c0_i32_0 = arith.constant 0 : i32
    %c0_i32_1 = arith.constant 0 : i32
    return %c0_i32, %c0_i32_0 : i32, i32
  }
  func.func @transform_2(%arg0: i32) -> (i32, i32) {
    %c0_i32 = arith.constant 0 : i32
    %c0_i32_0 = arith.constant 0 : i32
    %c0_i32_1 = arith.constant 0 : i32
    return %c0_i32, %c0_i32_0 : i32, i32
  }
  func.func @transform_3(%arg0: i32) -> (i32, i32) {
    %c0_i32 = arith.constant 0 : i32
    %c0_i32_0 = arith.constant 0 : i32
    %c0_i32_1 = arith.constant 0 : i32
    return %c0_i32, %c0_i32_0 : i32, i32
  }
}

</mosaic_0001>

<bundles_post_ra>
// kernel: tile.13
= control target key start
LH: loop header
LB: loop body
LE: loop exit
PB: predicated region body
PF: predicated region fallthrough
CT: control target
= control target key end

     0   :  { %s22_s0 = inlined_call_operand.vmem [shape: f32[32], index: 0, kind: input, shape index: {}]   ;;  %s23_s1 = inlined_call_operand.vmem [shape: f32[4,32], index: 1, kind: output, shape index: {}]  }
   0x1   :  { %v4_v0 = vld [vmem:[%s22_s0] ss:$0 sm:$0xff] }
   0x2   :  { %5 = vst [vmem:[%s23_s1] sm:$0xf] %v4_v0 }

// kernel: tile.18
= control target key start
LH: loop header
LB: loop body
LE: loop exit
PB: predicated region body
PF: predicated region fallthrough
CT: control target
= control target key end

     0   :  { %vm7_vm0 = vcmask 261120   ;;  %s37_s8 = smov 32   ;;  %s38_s9 = smov 64   ;;  %vm13_vm1 = vcmask 1048320   ;;  %vm19_vm2 = vcmask 785920   ;;  %vm25_vm3 = vcmask 523520   ;;  %s55_s0 = inlined_call_operand.vmem [shape: f32[4,32], index: 0, kind: input, shape index: {}]   ;;  %s56_s1 = inlined_call_operand.vmem [shape: f32[1,128], index: 1, kind: output, shape index: {}]  }
   0x1   :  { %v4_v0 = vld [vmem:[%s55_s0] sm:$0xf]  ;;  %s36_s0 = smov 96  }
   0x2   :  { %5 = vst [vmem:[#allocation1] sm:$0xf] %v4_v0 }
   0x9   :  { %v10_v1 = vld [vmem:[#allocation1 + $0x3] sm:$0x1]   ;;  %v22_v2 = vld [vmem:[#allocation1 + $0x1] sm:$0x1]   ;;  %v6_v3 = vld [vmem:[#allocation1] sm:$0x1]  }
   0xa   :  { %11 = vrot.lane.b32.xlu0 %v10_v1, %s36_s0  ;;  %23 = vrot.lane.b32.xlu1 %v22_v2, %s37_s8  ;;  %v16_v4 = vld [vmem:[#allocation1 + $0x2] sm:$0x1]   ;;  %8 = vst.msk [vmem:[#allocation0] sm:$0x1] %vm7_vm0, %v6_v3  }
   0xe   :  { %17 = vrot.lane.b32.xlu0 %v16_v4, %s38_s9 }
  0x7c   :  { %v12_v5 = vpop.permute.xlu0 %11   ;;  %v24_v6 = vpop.permute.xlu1 %23  }
  0x7d   :  { %14 = vst.msk [vmem:[#allocation0] sm:$0x1] %vm13_vm1, %v12_v5  }
  0x80   :  { %v18_v7 = vpop.permute.xlu0 %17  }
  0x81   :  { %20 = vst.msk [vmem:[#allocation0] sm:$0x1] %vm19_vm2, %v18_v7  }
  0x82   :  { %26 = vst.msk [vmem:[#allocation0] sm:$0x1] %vm25_vm3, %v24_v6  }
  0x89   :  { %v30_v8 = vld [vmem:[#allocation0] sm:$0x1] }
  0x8a   :  { %32 = vst [vmem:[%s56_s1] sm:$0x1] %v30_v8 }

// kernel: normalization_forward.1
= control target key start
LH: loop header
LB: loop body
LE: loop exit
PB: predicated region body
PF: predicated region fallthrough
CT: control target
= control target key end

     0   :  { %vm15_vm0 = vcmask 1043456   ;;  %s79_s14 = smov 64   ;;  %s80_s15 = smov 32   ;;  %v30_v10 = vlaneseq  ;;  %s115_s0 = inlined_call_operand.vmem [shape: f32[4,128], index: 0, kind: input, shape index: {}]   ;;  %s116_s1 = inlined_call_operand.vmem [shape: f32[1,128], index: 1, kind: input, shape index: {}]   ;;  %s117_s2 = inlined_call_operand.vmem [shape: f32[1,128], index: 2, kind: input, shape index: {}]   ;;  %s118_s3 = inlined_call_operand.vmem [shape: f32[4,128], index: 3, kind: output, shape index: {}]  }
   0x1   :  { %v14_v0 = vld [vmem:[%s115_s0] sm:$0xf] }
   0x2   :  { %v16_v1 = vsel %vm15_vm0, %v14_v0, 0.0  ;;  %v31_v11 = vshrl.u32 %v30_v10, 7  ;;  %v50_v32 = vld [vmem:[%s116_s1] sm:$0x1] }
   0x3   :  { %v17_v2 = vrot.slane %v16_v1, 4  ;;  %v74_v36 = vld [vmem:[%s117_s2] ss:$0 sm:$0xff] }
   0x4   :  { %v32_v13 = vsub.s32 0, %v31_v11 }
   0x5   :  { %v18_v3 = vadd.f32 %v17_v2, %v16_v1 }
   0x7   :  { %v19_v4 = vrot.slane %v18_v3, 2 }
   0x9   :  { %v20_v5 = vadd.f32 %v19_v4, %v18_v3 }
   0xb   :  { %v21_v6 = vrot.slane %v20_v5, 1 }
   0xd   :  { %v22_v7 = vadd.f32 %v21_v6, %v20_v5 }
   0xf   :  { %23 = vrot.lane.b32.xlu0 %v22_v7, %s79_s14 }
  0x81   :  { %v24_v8 = vpop.permute.xlu0 %23 }
  0x82   :  { %v25_v9 = vadd.f32 %v24_v8, %v22_v7 }
  0x84   :  { %26 = vrot.lane.b32.xlu0 %v25_v9, %s80_s15 }
  0xf6   :  { %v27_v12 = vpop.permute.xlu0 %26 }
  0xf7   :  { %v28_v14 = vadd.f32 %v27_v12, %v25_v9 }
  0xf9   :  { %v29_v15 = vmul.f32 0.0625, %v28_v14 }
  0xfb   :  { %v33_v16 = vrot.slane %v29_v15, %v32_v13 }
  0xfd   :  { %v34_v17 = vsub.f32 %v14_v0, %v33_v16 }
  0xff   :  { %v35_v18 = vmul.f32 %v34_v17, %v34_v17 }
 0x101   :  { %v36_v19 = vsel %vm15_vm0, %v35_v18, 0.0 }
 0x102   :  { %v37_v20 = vrot.slane %v36_v19, 4 }
 0x104   :  { %v38_v21 = vadd.f32 %v37_v20, %v36_v19 }
 0x106   :  { %v39_v22 = vrot.slane %v38_v21, 2 }
 0x108   :  { %v40_v23 = vadd.f32 %v39_v22, %v38_v21 }
 0x10a   :  { %v41_v24 = vrot.slane %v40_v23, 1 }
 0x10c   :  { %v42_v25 = vadd.f32 %v41_v24, %v40_v23 }
 0x10e   :  { %43 = vrot.lane.b32.xlu1 %v42_v25, %s79_s14 }
 0x180   :  { %v44_v26 = vpop.permute.xlu1 %43 }
 0x181   :  { %v45_v27 = vadd.f32 %v44_v26, %v42_v25 }
 0x183   :  { %46 = vrot.lane.b32.xlu1 %v45_v27, %s80_s15 }
 0x1f5   :  { %v47_v28 = vpop.permute.xlu1 %46 }
 0x1f6   :  { %v48_v29 = vadd.f32 %v47_v28, %v45_v27 }
 0x1f8   :  { %v49_v30 = vmul.f32 0.0625, %v48_v29 }
 0x1fa   :  { %v51_v31 = vadd.f32 1e-05, %v49_v30 }
 0x1fc   :  { %77 = vrsqrt.f32 %v51_v31 }
 0x206   :  { %v78_v33 = vpop.eup %77 }
 0x207   :  { %v53_v34 = vmul.f32 %v78_v33, %v50_v32 }
 0x209   :  { %v58_v35 = vrot.slane %v53_v34, %v32_v13 }
 0x20b   :  { %v60_v37 = vmul.f32 %v58_v35, %v34_v17 }
 0x20d   :  { %v68_v38 = vadd.f32 %v74_v36, %v60_v37 }
 0x20f   :  { %69 = vst [vmem:[%s118_s3] sm:$0xf] %v68_v38 }

</bundles_post_ra>
